<compile_context>
chip_gen: v5e
topology: v5e:2x2
jax: 0.10.0
libtpu: 0.0.40
codegen_flags: <defaults>
</compile_context>

<pallas_src>
import functools

import jax
import jax.numpy as jnp
import numpy as np
from jax.experimental import pallas as pl
from jax.experimental.pallas import tpu as pltpu


# ----------------------------- Pallas kernel -----------------------------
def _make_loss_kernel(row_shift, acc_rows):
    """row_shift = W (lane distance between vertically adjacent pixels in the
    flattened (C, H*W) image layout)."""

    def kernel(colmask_ref, rowmask_ref, gt_ref, pred_ref, burst_ref,
               out_ref, ggt_ref, gtf_ref):
        nf_idx = pl.program_id(1)
        tb, c, l = gt_ref.shape           # (batch tile, channels, H*W)
        n_frames = burst_ref.shape[1]     # burst frames handled per grid step

        # Hoist the (1, L) -> (C, L) mask broadcasts out of every loop
        # (JAX does not CSE broadcast_in_dim).
        colmask = jnp.broadcast_to(colmask_ref[...], (c, l))
        rowmask = jnp.broadcast_to(rowmask_ref[...], (c, l))

        def grad_l1(img):                               # img: (C, L) f32
            left = pltpu.roll(img, 1, axis=1) * colmask          # x[h, w-1], 0-fill
            up = pltpu.roll(img, row_shift, axis=1) * rowmask    # x[h-1, w], 0-fill
            return jnp.abs(left - img) + jnp.abs(up - img)

        def rowsum(v):                                  # (C, L) -> (acc_rows, L)
            if v.shape[0] == acc_rows:
                return v                                # accumulate full rows (VPU)
            # C > 8 and C % 8 == 0: fold sublane-tiles with pure VPU adds.
            return jnp.sum(v.reshape(v.shape[0] // 8, 8, v.shape[1]), axis=0)

        def contrib(x, gt, ggt):                        # per-image partial sums
            d = x - gt
            return rowsum(d * d + jnp.abs(grad_l1(x) - ggt))

        zero = jnp.zeros((acc_rows, l), jnp.float32)

        @pl.when(nf_idx == 0)
        def _first_chunk():
            def body(t, acc_basic):
                gt = gt_ref[t].astype(jnp.float32)
                ggt = grad_l1(gt)
                gtf_ref[t] = gt             # gt as f32: reused by later chunks
                ggt_ref[t] = ggt            # grad_L1(gt): reused by later chunks
                return acc_basic + contrib(pred_ref[t].astype(jnp.float32), gt, ggt)

            out_ref[0, 0] = jax.lax.fori_loop(0, tb, body, zero)
            out_ref[0, 1] = zero

        # Anneal-loss accumulation over the NF burst frames of this grid step.
        def t_body(t, acc_anneal):
            gt = gtf_ref[t]
            ggt = ggt_ref[t]

            def f_body(f, acc):
                x = burst_ref[t, f].astype(jnp.float32)
                return acc + contrib(x, gt, ggt)

            return jax.lax.fori_loop(0, n_frames, f_body, acc_anneal)

        out_ref[0, 1] += jax.lax.fori_loop(0, tb, t_body, zero)

    return kernel


# ------------------------------- wrappers -------------------------------
def _chip_config():
    """Chip-adaptive VMEM limits / budgets, TC count and burst buffering."""
    kind = ""
    try:
        kind = jax.devices()[0].device_kind.lower()
    except Exception:
        pass
    vmem_cap = 128 * 1024 * 1024
    try:
        info = pltpu.get_tpu_info()
        vmem_cap = int(getattr(info, "vmem_capacity_bytes", vmem_cap) or vmem_cap)
    except Exception:
        pass
    is_v7 = (vmem_cap <= 80 * 1024 * 1024) or ("v7" in kind) or ("7x" in kind) \
        or ("tpu7" in kind)
    two_tc = is_v7 or ("v4" in kind) or ("v5p" in kind)
    is_v5e = ("v5e" in kind) or ("v5 lite" in kind) or ("v5lite" in kind)
    if is_v7:                                   # 64 MiB VMEM per TensorCore
        vmem_limit = min(48 * 1024 * 1024, vmem_cap * 3 // 4)
    else:                                       # 128 MiB VMEM chips
        vmem_limit = min(96 * 1024 * 1024, vmem_cap * 3 // 4)
    budget = vmem_limit * 3 // 4
    nbuf = 3 if is_v5e else 2                   # extra burst buffer on low-BW v5e
    return vmem_limit, budget, two_tc, nbuf


def _pick_tiles(batch, n_frames, img_in_bytes, img_f32_bytes, budget, two_tc, nbuf):
    """Pick (TB, NF): batch-tile and frames-per-step, biggest blocks that fit
    the VMEM budget; keep >= 2 (preferably an even number of) outer blocks on
    2-TC chips so the 'parallel' axis feeds both TensorCores."""
    max_tb = batch
    if two_tc and batch > 1:
        max_tb = max(1, batch // 2)
    best, best_key = (1, 1), (-1, -1, -1)
    for tb in [d for d in range(1, batch + 1) if batch % d == 0 and d <= max_tb]:
        for nf in [d for d in range(1, n_frames + 1) if n_frames % d == 0]:
            resident = tb * (4 * img_in_bytes            # gt + pred, double-buffered
                             + nbuf * nf * img_in_bytes  # burst frame chunk
                             + 2 * img_f32_bytes)        # ggt + gt-f32 caches
            if resident > budget:
                continue
            outer_even = 1 if (not two_tc or (batch // tb) % 2 == 0) else 0
            key = (outer_even, tb * nf, nf)
            if key > best_key:
                best_key, best = key, (tb, nf)
    # TODO(synk): pad/repartition odd or prime batch sizes, and add halo-aware
    # H tiling for images whose C*H*W exceeds the budget even at TB=NF=1.
    return best


def _loss_partial_sums(pred_burst, pred, ground_truth):
    """Returns (sum over pred of sq+graddiff, sum over all burst frames)."""
    B, N, C, H, W = pred_burst.shape
    L = H * W
    in_bytes = jnp.dtype(pred_burst.dtype).itemsize
    img_in = C * L * in_bytes
    img_f32 = C * L * 4

    vmem_limit, budget, two_tc, nbuf = _chip_config()
    TB, NF = _pick_tiles(B, N, img_in, img_f32, budget, two_tc, nbuf)
    n_outer, n_inner = B // TB, N // NF

    # Accumulator rows: keep full C rows (<= 8) or fold to 8 sublanes; the
    # remaining reduce happens in XLA on a tiny array — no in-kernel XLU reduce.
    acc_rows = 8 if (C > 8 and C % 8 == 0) else C

    # Free (metadata-only) reshapes: trailing contiguous dims merged.
    gt3 = ground_truth.reshape(B, C, L)
    pred3 = pred.reshape(B, C, L)
    burst4 = pred_burst.reshape(B, N, C, L)

    # Boundary masks in the flattened layout (tiny, DMA'd once per core).
    lane = jax.lax.broadcasted_iota(jnp.int32, (1, L), 1)
    colmask = (lane % W != 0).astype(jnp.float32)   # no left neighbour at w == 0
    rowmask = (lane >= W).astype(jnp.float32)       # no upper neighbour at h == 0

    burst_map = lambda bb, nf: (bb, nf, 0, 0)
    burst_spec = pl.BlockSpec((TB, NF, C, L), burst_map)
    if nbuf > 2:
        try:   # deeper pipelining on v5e; fall back silently if unsupported
            burst_spec = pl.BlockSpec((TB, NF, C, L), burst_map,
                                      pipeline_mode=pl.Buffered(nbuf))
        except Exception:
            pass

    kernel = _make_loss_kernel(W, acc_rows)

    out = pl.pallas_call(
        kernel,
        out_shape=jax.ShapeDtypeStruct((n_outer, 2, acc_rows, L), jnp.float32),
        grid=(n_outer, n_inner),
        in_specs=[
            pl.BlockSpec((1, L), lambda bb, nf: (0, 0)),           # colmask
            pl.BlockSpec((1, L), lambda bb, nf: (0, 0)),           # rowmask
            pl.BlockSpec((TB, C, L), lambda bb, nf: (bb, 0, 0)),   # ground truth
            pl.BlockSpec((TB, C, L), lambda bb, nf: (bb, 0, 0)),   # pred
            burst_spec,                                            # burst frames
        ],
        out_specs=pl.BlockSpec((1, 2, acc_rows, L), lambda bb, nf: (bb, 0, 0, 0)),
        scratch_shapes=[pltpu.VMEM((TB, C, L), jnp.float32),   # grad_L1(gt) cache
                        pltpu.VMEM((TB, C, L), jnp.float32)],  # gt-as-f32 cache
        compiler_params=pltpu.CompilerParams(
            dimension_semantics=("parallel", "arbitrary"),
            vmem_limit_bytes=int(vmem_limit),
        ),
    )(colmask, rowmask, gt3, pred3, burst4)

    sums = jnp.sum(out, axis=(0, 2, 3))           # (2,) — tiny XLA epilogue
    return sums[0], sums[1]


@functools.partial(jax.jit, static_argnames=("coeff_basic", "coeff_anneal",
                                             "alpha", "beta"))
def loss_func(pred_burst, pred, ground_truth, global_step,
              coeff_basic=1.0, coeff_anneal=1.0, alpha=0.9998, beta=100.0):
    """pred_burst: (B,N,C,H,W); pred, ground_truth: (B,C,H,W)."""
    B, N, C, H, W = pred_burst.shape
    s_basic, s_anneal = _loss_partial_sums(pred_burst, pred, ground_truth)
    n_pix = jnp.float32(B * C * H * W)
    lb = jnp.float32(coeff_basic) * (s_basic / n_pix)
    anneal_scale = (jnp.float32(beta) *
                    jnp.float32(alpha) ** jnp.asarray(global_step, jnp.float32))
    la = jnp.float32(coeff_anneal) * anneal_scale * (s_anneal / (n_pix * N))
    return lb, la


# ------------------------- pure-JAX reference -------------------------
def _grad_l1_ref(img):
    nd = img.ndim
    pad_w = [(0, 0)] * (nd - 1) + [(1, 0)]
    pad_h = [(0, 0)] * (nd - 2) + [(1, 0), (0, 0)]
    sr = jnp.pad(img, pad_w)[..., :, :-1]
    sd = jnp.pad(img, pad_h)[..., :-1, :]
    return jnp.abs(sr - img) + jnp.abs(sd - img)


def _loss_basic_ref(pred, gt):
    mse = jnp.mean((pred - gt) ** 2)
    l1 = jnp.mean(jnp.abs(_grad_l1_ref(pred) - _grad_l1_ref(gt)))
    return mse + l1


def _loss_func_ref(pred_burst, pred, gt, global_step,
                   coeff_basic=1.0, coeff_anneal=1.0, alpha=0.9998, beta=100.0):
    lb = coeff_basic * _loss_basic_ref(pred, gt)
    N = pred_burst.shape[1]
    acc = 0.0
    for i in range(N):
        acc = acc + _loss_basic_ref(pred_burst[:, i], gt)
    la = coeff_anneal * beta * alpha ** global_step * (acc / N)
    return lb, la


if __name__ == "__main__":
    key = jax.random.PRNGKey(0)
    B, N, C, H, W = 2, 3, 4, 16, 16
    k1, k2, k3 = jax.random.split(key, 3)
    pred_burst = jax.random.normal(k1, (B, N, C, H, W), jnp.float32)
    pred = jax.random.normal(k2, (B, C, H, W), jnp.float32)
    ground_truth = jax.random.normal(k3, (B, C, H, W), jnp.float32)
    global_step = 100

    basic, anneal = loss_func(pred_burst, pred, ground_truth, global_step)
    jax.block_until_ready((basic, anneal))

    ref_basic, ref_anneal = _loss_func_ref(pred_burst, pred, ground_truth,
                                           global_step)
    np.testing.assert_allclose(np.asarray(basic), np.asarray(ref_basic),
                               rtol=1e-4, atol=1e-5)
    np.testing.assert_allclose(np.asarray(anneal), np.asarray(ref_anneal),
                               rtol=1e-4, atol=1e-5)
    print("KERNEL_OK")
</pallas_src>

<mosaic_0001>
module attributes {stable_mosaic.version = 11 : i64} {
  func.func @kernel(%arg0: i32, %arg1: i32, %arg2: memref<1x256xf32, #tpu.memory_space<vmem>>, %arg3: memref<1x256xf32, #tpu.memory_space<vmem>>, %arg4: memref<2x4x256xf32, #tpu.memory_space<vmem>>, %arg5: memref<2x4x256xf32, #tpu.memory_space<vmem>>, %arg6: memref<2x3x4x256xf32, #tpu.memory_space<vmem>>, %arg7: memref<1x2x4x256xf32, #tpu.memory_space<vmem>>, %arg8: memref<2x4x256xf32, #tpu.memory_space<vmem>>, %arg9: memref<2x4x256xf32, #tpu.memory_space<vmem>>) attributes {dimension_semantics = [#tpu.dimension_semantics<parallel>, #tpu.dimension_semantics<arbitrary>], iteration_bounds = array<i64: 1, 1>, scalar_prefetch = 0 : i64, scratch_operands = 2 : i64, tpu.core_type = #tpu.core_type<tc>, window_params = [{pipeline_mode = #tpu.pipeline_mode<synchronous>, transform_indices = @transform_0, window_bounds = array<i64: 1, 256>}, {pipeline_mode = #tpu.pipeline_mode<synchronous>, transform_indices = @transform_1, window_bounds = array<i64: 1, 256>}, {transform_indices = @transform_2, window_bounds = array<i64: 2, 4, 256>}, {transform_indices = @transform_3, window_bounds = array<i64: 2, 4, 256>}, {transform_indices = @transform_4, window_bounds = array<i64: 2, 3, 4, 256>}, {transform_indices = @transform_5, window_bounds = array<i64: 1, 2, 4, 256>}]} {
    %c0 = arith.constant 0 : index
    %c0_0 = arith.constant 0 : index
    %0 = vector.load %arg2[%c0, %c0_0] : memref<1x256xf32, #tpu.memory_space<vmem>>, vector<1x256xf32>
    %1 = vector.shape_cast %0 : vector<1x256xf32> to vector<1x256xf32>
    %2 = vector.broadcast %1 : vector<1x256xf32> to vector<4x256xf32>
    %c0_1 = arith.constant 0 : index
    %c0_2 = arith.constant 0 : index
    %3 = vector.load %arg3[%c0_1, %c0_2] : memref<1x256xf32, #tpu.memory_space<vmem>>, vector<1x256xf32>
    %4 = vector.shape_cast %3 : vector<1x256xf32> to vector<1x256xf32>
    %5 = vector.broadcast %4 : vector<1x256xf32> to vector<4x256xf32>
    %cst = arith.constant 0.000000e+00 : f32
    %6 = vector.broadcast %cst : f32 to vector<4x256xf32>
    %c0_i32 = arith.constant 0 : i32
    %7 = arith.cmpi eq, %arg1, %c0_i32 : i32
    %8 = arith.extui %7 : i1 to i32
    %c0_i32_3 = arith.constant 0 : i32
    %9 = arith.cmpi ne, %8, %c0_i32_3 : i32
    scf.if %9 {
      %c0_i32_13 = arith.constant 0 : i32
      %c2_i32_14 = arith.constant 2 : i32
      %18 = arith.addi %c0_i32_13, %c2_i32_14 : i32
      %c1_i32_15 = arith.constant 1 : i32
      %19 = scf.for %arg10 = %c0_i32_13 to %18 step %c1_i32_15 iter_args(%arg11 = %6) -> (vector<4x256xf32>)  : i32 {
        %26 = arith.index_cast %arg10 : i32 to index
        %c0_25 = arith.constant 0 : index
        %c0_26 = arith.constant 0 : index
        %27 = vector.load %arg4[%26, %c0_25, %c0_26] : memref<2x4x256xf32, #tpu.memory_space<vmem>>, vector<1x4x256xf32>
        %28 = vector.shape_cast %27 : vector<1x4x256xf32> to vector<4x256xf32>
        %c1_i32_27 = arith.constant 1 : i32
        %29 = tpu.dynamic_rotate %28 by %c1_i32_27 dim 1 : vector<4x256xf32>, i32 -> vector<4x256xf32>
        %30 = arith.mulf %29, %2 : vector<4x256xf32>
        %c16_i32 = arith.constant 16 : i32
        %31 = tpu.dynamic_rotate %28 by %c16_i32 dim 1 : vector<4x256xf32>, i32 -> vector<4x256xf32>
        %32 = arith.mulf %31, %5 : vector<4x256xf32>
        %33 = arith.subf %30, %28 : vector<4x256xf32>
        %34 = math.absf %33 : vector<4x256xf32>
        %35 = arith.subf %32, %28 : vector<4x256xf32>
        %36 = math.absf %35 : vector<4x256xf32>
        %37 = arith.addf %34, %36 : vector<4x256xf32>
        %38 = arith.index_cast %arg10 : i32 to index
        %c0_28 = arith.constant 0 : index
        %c0_29 = arith.constant 0 : index
        %39 = vector.load %arg9[%38, %c0_28, %c0_29] : memref<2x4x256xf32, #tpu.memory_space<vmem>>, vector<1x4x256xf32>
        %40 = vector.shape_cast %39 : vector<1x4x256xf32> to vector<4x256xf32>
        %41 = vector.shape_cast %28 : vector<4x256xf32> to vector<1x4x256xf32>
        tpu.vector_store %arg9[%38, %c0_28, %c0_29], %41 {strides = array<i32>} : memref<2x4x256xf32, #tpu.memory_space<vmem>>, vector<1x4x256xf32>,
        %42 = arith.index_cast %arg10 : i32 to index
        %c0_30 = arith.constant 0 : index
        %c0_31 = arith.constant 0 : index
        %43 = vector.load %arg8[%42, %c0_30, %c0_31] : memref<2x4x256xf32, #tpu.memory_space<vmem>>, vector<1x4x256xf32>
        %44 = vector.shape_cast %43 : vector<1x4x256xf32> to vector<4x256xf32>
        %45 = vector.shape_cast %37 : vector<4x256xf32> to vector<1x4x256xf32>
        tpu.vector_store %arg8[%42, %c0_30, %c0_31], %45 {strides = array<i32>} : memref<2x4x256xf32, #tpu.memory_space<vmem>>, vector<1x4x256xf32>,
        %46 = arith.index_cast %arg10 : i32 to index
        %c0_32 = arith.constant 0 : index
        %c0_33 = arith.constant 0 : index
        %47 = vector.load %arg5[%46, %c0_32, %c0_33] : memref<2x4x256xf32, #tpu.memory_space<vmem>>, vector<1x4x256xf32>
        %48 = vector.shape_cast %47 : vector<1x4x256xf32> to vector<4x256xf32>
        %49 = arith.subf %48, %28 : vector<4x256xf32>
        %50 = arith.mulf %49, %49 : vector<4x256xf32>
        %c1_i32_34 = arith.constant 1 : i32
        %51 = tpu.dynamic_rotate %48 by %c1_i32_34 dim 1 : vector<4x256xf32>, i32 -> vector<4x256xf32>
        %52 = arith.mulf %51, %2 : vector<4x256xf32>
        %c16_i32_35 = arith.constant 16 : i32
        %53 = tpu.dynamic_rotate %48 by %c16_i32_35 dim 1 : vector<4x256xf32>, i32 -> vector<4x256xf32>
        %54 = arith.mulf %53, %5 : vector<4x256xf32>
        %55 = arith.subf %52, %48 : vector<4x256xf32>
        %56 = math.absf %55 : vector<4x256xf32>
        %57 = arith.subf %54, %48 : vector<4x256xf32>
        %58 = math.absf %57 : vector<4x256xf32>
        %59 = arith.addf %56, %58 : vector<4x256xf32>
        %60 = arith.subf %59, %37 : vector<4x256xf32>
        %61 = math.absf %60 : vector<4x256xf32>
        %62 = arith.addf %50, %61 : vector<4x256xf32>
        %63 = arith.addf %arg11, %62 : vector<4x256xf32>
        scf.yield %63 : vector<4x256xf32>
      }
      %c2_i32_16 = arith.constant 2 : i32
      %c0_17 = arith.constant 0 : index
      %c0_18 = arith.constant 0 : index
      %c0_19 = arith.constant 0 : index
      %c0_20 = arith.constant 0 : index
      %20 = vector.load %arg7[%c0_17, %c0_18, %c0_19, %c0_20] : memref<1x2x4x256xf32, #tpu.memory_space<vmem>>, vector<1x1x4x256xf32>
      %21 = vector.shape_cast %20 : vector<1x1x4x256xf32> to vector<4x256xf32>
      %22 = vector.shape_cast %19 : vector<4x256xf32> to vector<1x1x4x256xf32>
      tpu.vector_store %arg7[%c0_17, %c0_18, %c0_19, %c0_20], %22 {strides = array<i32>} : memref<1x2x4x256xf32, #tpu.memory_space<vmem>>, vector<1x1x4x256xf32>,
      %c0_21 = arith.constant 0 : index
      %c1_22 = arith.constant 1 : index
      %c0_23 = arith.constant 0 : index
      %c0_24 = arith.constant 0 : index
      %23 = vector.load %arg7[%c0_21, %c1_22, %c0_23, %c0_24] : memref<1x2x4x256xf32, #tpu.memory_space<vmem>>, vector<1x1x4x256xf32>
      %24 = vector.shape_cast %23 : vector<1x1x4x256xf32> to vector<4x256xf32>
      %25 = vector.shape_cast %6 : vector<4x256xf32> to vector<1x1x4x256xf32>
      tpu.vector_store %arg7[%c0_21, %c1_22, %c0_23, %c0_24], %25 {strides = array<i32>} : memref<1x2x4x256xf32, #tpu.memory_space<vmem>>, vector<1x1x4x256xf32>,
    } else {
    }
    %c0_4 = arith.constant 0 : index
    %c1 = arith.constant 1 : index
    %c0_5 = arith.constant 0 : index
    %c0_6 = arith.constant 0 : index
    %10 = vector.load %arg7[%c0_4, %c1, %c0_5, %c0_6] : memref<1x2x4x256xf32, #tpu.memory_space<vmem>>, vector<1x1x4x256xf32>
    %11 = vector.shape_cast %10 : vector<1x1x4x256xf32> to vector<4x256xf32>
    %c0_i32_7 = arith.constant 0 : i32
    %c2_i32 = arith.constant 2 : i32
    %12 = arith.addi %c0_i32_7, %c2_i32 : i32
    %c1_i32 = arith.constant 1 : i32
    %13 = scf.for %arg10 = %c0_i32_7 to %12 step %c1_i32 iter_args(%arg11 = %6) -> (vector<4x256xf32>)  : i32 {
      %18 = arith.index_cast %arg10 : i32 to index
      %c0_13 = arith.constant 0 : index
      %c0_14 = arith.constant 0 : index
      %19 = vector.load %arg9[%18, %c0_13, %c0_14] : memref<2x4x256xf32, #tpu.memory_space<vmem>>, vector<1x4x256xf32>
      %20 = vector.shape_cast %19 : vector<1x4x256xf32> to vector<4x256xf32>
      %21 = arith.index_cast %arg10 : i32 to index
      %c0_15 = arith.constant 0 : index
      %c0_16 = arith.constant 0 : index
      %22 = vector.load %arg8[%21, %c0_15, %c0_16] : memref<2x4x256xf32, #tpu.memory_space<vmem>>, vector<1x4x256xf32>
      %23 = vector.shape_cast %22 : vector<1x4x256xf32> to vector<4x256xf32>
      %c0_i32_17 = arith.constant 0 : i32
      %c3_i32 = arith.constant 3 : i32
      %24 = arith.addi %c0_i32_17, %c3_i32 : i32
      %c1_i32_18 = arith.constant 1 : i32
      %25 = scf.for %arg12 = %c0_i32_17 to %24 step %c1_i32_18 iter_args(%arg13 = %arg11) -> (vector<4x256xf32>)  : i32 {
        %26 = arith.index_cast %arg10 : i32 to index
        %27 = arith.index_cast %arg12 : i32 to index
        %c0_20 = arith.constant 0 : index
        %c0_21 = arith.constant 0 : index
        %28 = vector.load %arg6[%26, %27, %c0_20, %c0_21] : memref<2x3x4x256xf32, #tpu.memory_space<vmem>>, vector<1x1x4x256xf32>
        %29 = vector.shape_cast %28 : vector<1x1x4x256xf32> to vector<4x256xf32>
        %30 = arith.subf %29, %20 : vector<4x256xf32>
        %31 = arith.mulf %30, %30 : vector<4x256xf32>
        %c1_i32_22 = arith.constant 1 : i32
        %32 = tpu.dynamic_rotate %29 by %c1_i32_22 dim 1 : vector<4x256xf32>, i32 -> vector<4x256xf32>
        %33 = arith.mulf %32, %2 : vector<4x256xf32>
        %c16_i32 = arith.constant 16 : i32
        %34 = tpu.dynamic_rotate %29 by %c16_i32 dim 1 : vector<4x256xf32>, i32 -> vector<4x256xf32>
        %35 = arith.mulf %34, %5 : vector<4x256xf32>
        %36 = arith.subf %33, %29 : vector<4x256xf32>
        %37 = math.absf %36 : vector<4x256xf32>
        %38 = arith.subf %35, %29 : vector<4x256xf32>
        %39 = math.absf %38 : vector<4x256xf32>
        %40 = arith.addf %37, %39 : vector<4x256xf32>
        %41 = arith.subf %40, %23 : vector<4x256xf32>
        %42 = math.absf %41 : vector<4x256xf32>
        %43 = arith.addf %31, %42 : vector<4x256xf32>
        %44 = arith.addf %arg13, %43 : vector<4x256xf32>
        scf.yield %44 : vector<4x256xf32>
      }
      %c3_i32_19 = arith.constant 3 : i32
      scf.yield %25 : vector<4x256xf32>
    }
    %c2_i32_8 = arith.constant 2 : i32
    %14 = arith.addf %11, %13 : vector<4x256xf32>
    %c0_9 = arith.constant 0 : index
    %c1_10 = arith.constant 1 : index
    %c0_11 = arith.constant 0 : index
    %c0_12 = arith.constant 0 : index
    %15 = vector.load %arg7[%c0_9, %c1_10, %c0_11, %c0_12] : memref<1x2x4x256xf32, #tpu.memory_space<vmem>>, vector<1x1x4x256xf32>
    %16 = vector.shape_cast %15 : vector<1x1x4x256xf32> to vector<4x256xf32>
    %17 = vector.shape_cast %14 : vector<4x256xf32> to vector<1x1x4x256xf32>
    tpu.vector_store %arg7[%c0_9, %c1_10, %c0_11, %c0_12], %17 {strides = array<i32>} : memref<1x2x4x256xf32, #tpu.memory_space<vmem>>, vector<1x1x4x256xf32>,
    return
  }
  func.func @transform_0(%arg0: i32, %arg1: i32) -> (i32, i32) {
    %c0_i32 = arith.constant 0 : i32
    %c0_i32_0 = arith.constant 0 : i32
    %c0_i32_1 = arith.constant 0 : i32
    return %c0_i32, %c0_i32_0 : i32, i32
  }
  func.func @transform_1(%arg0: i32, %arg1: i32) -> (i32, i32) {
    %c0_i32 = arith.constant 0 : i32
    %c0_i32_0 = arith.constant 0 : i32
    %c0_i32_1 = arith.constant 0 : i32
    return %c0_i32, %c0_i32_0 : i32, i32
  }
  func.func @transform_2(%arg0: i32, %arg1: i32) -> (i32, i32, i32) {
    %c0_i32 = arith.constant 0 : i32
    %c0_i32_0 = arith.constant 0 : i32
    %c0_i32_1 = arith.constant 0 : i32
    return %arg0, %c0_i32, %c0_i32_0 : i32, i32, i32
  }
  func.func @transform_3(%arg0: i32, %arg1: i32) -> (i32, i32, i32) {
    %c0_i32 = arith.constant 0 : i32
    %c0_i32_0 = arith.constant 0 : i32
    %c0_i32_1 = arith.constant 0 : i32
    return %arg0, %c0_i32, %c0_i32_0 : i32, i32, i32
  }
  func.func @transform_4(%arg0: i32, %arg1: i32) -> (i32, i32, i32, i32) {
    %c0_i32 = arith.constant 0 : i32
    %c0_i32_0 = arith.constant 0 : i32
    %c0_i32_1 = arith.constant 0 : i32
    return %arg0, %arg1, %c0_i32, %c0_i32_0 : i32, i32, i32, i32
  }
  func.func @transform_5(%arg0: i32, %arg1: i32) -> (i32, i32, i32, i32) {
    %c0_i32 = arith.constant 0 : i32
    %c0_i32_0 = arith.constant 0 : i32
    %c0_i32_1 = arith.constant 0 : i32
    %c0_i32_2 = arith.constant 0 : i32
    return %arg0, %c0_i32, %c0_i32_0, %c0_i32_1 : i32, i32, i32, i32
  }
}

</mosaic_0001>

<bundles_post_ra>
// kernel: loss_func.1
= control target key start
LH: loop header
LB: loop body
LE: loop exit
PB: predicated region body
PF: predicated region fallthrough
CT: control target
= control target key end

     0   :  { %v492_v6 = vmov 0.0   ;;  %s494_s22 = smov 0   ;;  %s626_s0 = inlined_call_operand.vmem [shape: f32[1,256], index: 0, kind: input, shape index: {}]   ;;  %s627_s1 = inlined_call_operand.vmem [shape: f32[1,256], index: 1, kind: input, shape index: {}]   ;;  %s628_s2 = inlined_call_operand.vmem [shape: f32[2,4,256], index: 2, kind: input, shape index: {}]   ;;  %s629_s3 = inlined_call_operand.vmem [shape: f32[2,4,256], index: 3, kind: input, shape index: {}]   ;;  %s630_s4 = inlined_call_operand.vmem [shape: f32[2,3,4,256], index: 4, kind: input, shape index: {}]   ;;  %s631_s5 = inlined_call_operand.vmem [shape: f32[1,2,4,256], index: 5, kind: output, shape index: {}]  }
   0x1   :  { %v20_v0 = vld [vmem:[%s626_s0] sm:$0x3] }
   0x2   :  { %v26_v1 = vld [vmem:[%s627_s1] sm:$0x3]  ;;  %v484_v2 = vperm.slane %v20_v0, 0  ;;  %v486_v3 = vperm.slane %v20_v0, 1 }
   0x3   :  { %v488_v4 = vperm.slane %v26_v1, 0  ;;  %v490_v5 = vperm.slane %v26_v1, 1 }
   0x4 LB: > { %s503_s0 = sshll.u32 %s425_s22, 3  ;;  %s443_s26 = smov 1   ;;  %v57_v23 = vlaneseq  ;;  %vm104_vm2 = vcmask 1043456   ;;  %s425_s22 = sphi %s494_s22, %s41_s22   ;;  %v421_v6 = vphi %v492_v6, %v632_v6  }
   0x5   : > { %s45_s24 = scalar_lea.vmem %s628_s2, %s503_s0  ;;  %s99_s25 = scalar_lea.vmem [#allocation3], %s503_s0 }
   0x6   : > { %v509_v7 = vld [vmem:[%s45_s24] sm:$0xff]  ;;  %s444_s27 = smov 16   ;;  %s111_s30 = scalar_lea.vmem %s629_s3, %s503_s0  ;;  %v527_v25 = vand.u32 127, %v57_v23 }
   0x7   : > { %48 = vst [vmem:[#allocation1] ss:$2 sm:$0xff] %v509_v7  ;;  %v521_v14 = vld [vmem:[%s111_s30] sm:$0xff]  ;;  %s108_s6 = scalar_lea.vmem [#allocation2], %s503_s0  ;;  %s41_s22 = sadd.s32 1, %s425_s22  }
   0x8   : > { %100 = vst [vmem:[%s99_s25] sm:$0xff] %v509_v7  ;;  %vm59_vm0 = vcmp.lt.s32.totalorder %v527_v25, 1  ;;  %vm73_vm1 = vcmp.lt.s32.totalorder %v527_v25, 16  ;;  %p38_p0 = scmp.ge.s32.totalorder %s41_s22, 2  }
   0x9   :  { %s574_s11 = smov (%p38_p0), 0  }
   0xe   : > { %v49_v8 = vld.sshfl [vmem:[#allocation1] sm:$0xff pattern:$0x75316420]  ;;  %v50_v9 = vld.sshfl [vmem:[#allocation1 + $0x8] sm:$0xff pattern:$0x75316420] }
   0xf   : > { %53 = vrot.lane.b32.xlu0 %v49_v8, %s443_s26  ;;  %64 = vst [vmem:[#allocation1] ss:$2 sm:$0xff] %v509_v7 }
  0x16   : > { %v65_v10 = vld.sshfl [vmem:[#allocation1] sm:$0xff pattern:$0x75316420]  ;;  %v66_v11 = vld.sshfl [vmem:[#allocation1 + $0x8] sm:$0xff pattern:$0x75316420] }
  0x17   : > { %69 = vrot.lane.b32.xlu1 %v65_v10, %s444_s27  ;;  %55 = vrot.lane.b32.xlu0 %v50_v9, %s443_s26  ;;  %78 = vst [vmem:[#allocation1] ss:$2 sm:$0xff] %v509_v7 }
  0x1e   : > { %v79_v12 = vld.sshfl [vmem:[#allocation1] sm:$0xff pattern:$0x75316420]  ;;  %v80_v13 = vld.sshfl [vmem:[#allocation1 + $0x8] sm:$0xff pattern:$0x75316420] }
  0x1f   : > { %71 = vrot.lane.b32.xlu1 %v66_v11, %s444_s27  ;;  %87 = vst [vmem:[#allocation1] ss:$2 sm:$0xff] %v509_v7 }
  0x26   : > { %v88_v15 = vld.sshfl [vmem:[#allocation1] sm:$0xff pattern:$0x75316420]  ;;  %v89_v16 = vld.sshfl [vmem:[#allocation1 + $0x8] sm:$0xff pattern:$0x75316420] }
  0x27   : > { %116 = vst [vmem:[#allocation1] ss:$2 sm:$0xff] %v521_v14 }
  0x2e   : > { %v117_v17 = vld.sshfl [vmem:[#allocation1] sm:$0xff pattern:$0x75316420]  ;;  %v118_v18 = vld.sshfl [vmem:[#allocation1 + $0x8] sm:$0xff pattern:$0x75316420] }
  0x2f   : > { %129 = vst [vmem:[#allocation1] ss:$2 sm:$0xff] %v521_v14  ;;  %121 = vrot.lane.b32.xlu2 %v117_v17, %s443_s26 }
  0x36   : > { %v131_v19 = vld.sshfl [vmem:[#allocation1 + $0x8] sm:$0xff pattern:$0x75316420]  ;;  %v130_v20 = vld.sshfl [vmem:[#allocation1] sm:$0xff pattern:$0x75316420] }
  0x37   : > { %136 = vrot.lane.b32.xlu1 %v131_v19, %s444_s27  ;;  %134 = vrot.lane.b32.xlu0 %v130_v20, %s444_s27  ;;  %142 = vst [vmem:[#allocation1] ss:$2 sm:$0xff] %v521_v14 }
  0x38   : > { %123 = vrot.lane.b32.xlu2 %v118_v18, %s443_s26 }
  0x3e   : > { %v143_v21 = vld.sshfl [vmem:[#allocation1] sm:$0xff pattern:$0x75316420]  ;;  %v144_v22 = vld.sshfl [vmem:[#allocation1 + $0x8] sm:$0xff pattern:$0x75316420] }
  0x3f   : > { %151 = vst [vmem:[#allocation1] ss:$2 sm:$0xff] %v521_v14 }
  0x46   : > { %v152_v60 = vld.sshfl [vmem:[#allocation1] sm:$0xff pattern:$0x75316420]  ;;  %v153_v61 = vld.sshfl [vmem:[#allocation1 + $0x8] sm:$0xff pattern:$0x75316420] }
  0x81   : > { %v54_v24 = vpop.permute.xlu0 %53 }
  0x89   : > { %v70_v26 = vpop.permute.xlu1 %69  ;;  %v56_v27 = vpop.permute.xlu0 %55 }
  0x8a   : > { %v60_v28 = vsel %vm59_vm0, %v54_v24, %v56_v27  ;;  %v61_v29 = vsel %vm59_vm0, %v56_v27, %v54_v24  ;;  %v122_v43 = vpop.permute.xlu2 %121 }
  0x8b   : > { %v62_v30 = vmul.f32 %v61_v29, %v484_v2  ;;  %v63_v31 = vmul.f32 %v60_v28, %v486_v3 }
  0x8d   : > { %v83_v32 = vsub.f32 %v62_v30, %v79_v12  ;;  %v84_v33 = vsub.f32 %v63_v31, %v80_v13 }
  0x8f   : > { %v85_v39 = vand.u32 2147483647, %v83_v32  ;;  %v86_v40 = vand.u32 2147483647, %v84_v33 }
  0x91   : > { %v72_v34 = vpop.permute.xlu1 %71 }
  0x92   : > { %v74_v35 = vsel %vm73_vm1, %v70_v26, %v72_v34  ;;  %v75_v36 = vsel %vm73_vm1, %v72_v34, %v70_v26  ;;  %v124_v50 = vpop.permute.xlu2 %123 }
  0x93   : > { %v76_v37 = vmul.f32 %v75_v36, %v488_v4  ;;  %v77_v38 = vmul.f32 %v74_v35, %v490_v5  ;;  %v126_v51 = vsel %vm59_vm0, %v124_v50, %v122_v43  ;;  %v125_v52 = vsel %vm59_vm0, %v122_v43, %v124_v50 }
  0x94   : > { %v127_v53 = vmul.f32 %v126_v51, %v484_v2  ;;  %v128_v54 = vmul.f32 %v125_v52, %v486_v3 }
  0x95   : > { %v92_v41 = vsub.f32 %v76_v37, %v88_v15  ;;  %v93_v42 = vsub.f32 %v77_v38, %v89_v16  ;;  %v113_v16 = vsub.f32 %v521_v14, %v509_v7  ;;  %v445_v7 = vmov (%p38_p0), 0.0  }
  0x96   : > { %v147_v57 = vsub.f32 %v127_v53, %v143_v21  ;;  %v148_v62 = vsub.f32 %v128_v54, %v144_v22  ;;  %328 = vst [vmem:[%s631_s5 + $0x8] sm:$0xff] (%p38_p0), %v445_v7  ;;  %v572_v14 = vmov (%p38_p0), 0.0  }
  0x97   : > { %v94_v44 = vand.u32 2147483647, %v92_v41  ;;  %v95_v45 = vand.u32 2147483647, %v93_v42  ;;  %v114_v20 = vmul.f32 %v113_v16, %v113_v16 }
  0x98   : > { %v149_v9 = vand.u32 2147483647, %v147_v57  ;;  %v150_v10 = vand.u32 2147483647, %v148_v62 }
  0x99   : > { %v96_v46 = vadd.f32 %v94_v44, %v85_v39  ;;  %v97_v47 = vadd.f32 %v95_v45, %v86_v40 }
  0x9b   : > { %v103_v48 = vrot.slane %v97_v47, 4 }
  0x9d   : > { %v105_v49 = vsel %vm104_vm2, %v96_v46, %v103_v48 }
  0x9e   : > { %109 = vst [vmem:[%s108_s6] sm:$0xff] %v105_v49 }
  0xa9   : > { %v137_v55 = vpop.permute.xlu1 %136  ;;  %v135_v56 = vpop.permute.xlu0 %134 }
  0xaa   : > { %v138_v58 = vsel %vm73_vm1, %v135_v56, %v137_v55  ;;  %v139_v59 = vsel %vm73_vm1, %v137_v55, %v135_v56 }
  0xab   : > { %v140_v63 = vmul.f32 %v139_v59, %v488_v4  ;;  %v141_v0 = vmul.f32 %v138_v58, %v490_v5 }
  0xad   : > { %v156_v1 = vsub.f32 %v140_v63, %v152_v60  ;;  %v157_v8 = vsub.f32 %v141_v0, %v153_v61 }
  0xaf   : > { %v158_v11 = vand.u32 2147483647, %v156_v1  ;;  %v159_v12 = vand.u32 2147483647, %v157_v8 }
  0xb1   : > { %v160_v13 = vadd.f32 %v158_v11, %v149_v9  ;;  %v161_v15 = vadd.f32 %v159_v12, %v150_v10 }
  0xb3   : > { %v162_v17 = vsub.f32 %v160_v13, %v96_v46  ;;  %v163_v18 = vsub.f32 %v161_v15, %v97_v47 }
  0xb5   : > { %v165_v19 = vand.u32 2147483647, %v163_v18  ;;  %v164_v21 = vand.u32 2147483647, %v162_v17 }
  0xb7   : > { %v168_v22 = vrot.slane %v165_v19, 4 }
  0xb9   : > { %v169_v23 = vsel %vm104_vm2, %v164_v21, %v168_v22 }
  0xba   : > { %v171_v24 = vadd.f32 %v169_v23, %v114_v20  ;;  %40 = sbr.rel (!%p38_p0) target bundleno = 4 (0x4), region = 74 }
  0xbc   : > { %v172_v26 = vadd.f32 %v421_v6, %v171_v24  }
  0xbe   : > { %v632_v6 = vmov %v172_v26  ;;  %173 = vst [vmem:[%s631_s5] sm:$0xff] (%p38_p0), %v172_v26 }
  0xbf LB: > { %s340_s2 = sshll.u32 %s433_s11, 3  ;;  %s587_s13 = smov 0   ;;  %s433_s11 = sphi %s574_s11, %s183_s11   ;;  %v429_v14 = vphi %v572_v14, %v634_v14  }
  0xc0   : > { %s187_s3 = scalar_lea.vmem [#allocation3], %s340_s2  ;;  %s190_s12 = scalar_lea.vmem [#allocation2], %s340_s2 }
  0xc1   : > { %v581_v6 = vld [vmem:[%s187_s3] sm:$0xff] }
  0xc2   : > { %v583_v27 = vld [vmem:[%s190_s12] sm:$0xff] }
  0xc3 LB: >> { %s200_s14 = smul.u32 6, %s433_s11  ;;  %s333_s15 = sshll.u32 %s441_s13, 1  ;;  %s441_s13 = sphi %s587_s13, %s197_s13   ;;  %v437_v14 = vphi %v429_v14, %v633_v14  }
  0xc4   : >> { %s446_s21 = smov 1   ;;  %s447_s22 = smov 16  }
  0xc5   : >> { %s201_s16 = sadd.s32 %s333_s15, %s200_s14  ;;  %s197_s13 = sadd.s32 1, %s441_s13  }
  0xc6   : >> { %s334_s17 = sshll.u32 %s201_s16, 2  ;;  %p194_p1 = scmp.ge.s32.totalorder %s197_s13, 3  }
  0xc7   : >> { %s203_s20 = scalar_lea.vmem %s630_s4, %s334_s17  ;;  %s183_s11 = sadd.s32 (%p194_p1), 1, %s433_s11  }
  0xc8   : >> { %v204_v28 = vld [vmem:[%s203_s20] sm:$0xff]  ;;  %p180_p2 = scmp.ge.s32.totalorder (%p194_p1), %s183_s11, 2  }
  0xc9   : >> { %208 = vst [vmem:[#allocation1] ss:$2 sm:$0xff] %v204_v28  ;;  %v205_v61 = vsub.f32 %v204_v28, %v581_v6 }
  0xcb   : >> { %v206_v1 = vmul.f32 %v205_v61, %v205_v61 }
  0xd0   : >> { %v209_v29 = vld.sshfl [vmem:[#allocation1] sm:$0xff pattern:$0x75316420]  ;;  %v210_v30 = vld.sshfl [vmem:[#allocation1 + $0x8] sm:$0xff pattern:$0x75316420] }
  0xd1   : >> { %213 = vrot.lane.b32.xlu0 %v209_v29, %s446_s21  ;;  %224 = vst [vmem:[#allocation1] ss:$2 sm:$0xff] %v204_v28 }
  0xd8   : >> { %v225_v31 = vld.sshfl [vmem:[#allocation1] sm:$0xff pattern:$0x75316420]  ;;  %v226_v32 = vld.sshfl [vmem:[#allocation1 + $0x8] sm:$0xff pattern:$0x75316420] }
  0xd9   : >> { %215 = vrot.lane.b32.xlu0 %v210_v30, %s446_s21  ;;  %229 = vrot.lane.b32.xlu1 %v225_v31, %s447_s22  ;;  %238 = vst [vmem:[#allocation1] ss:$2 sm:$0xff] %v204_v28 }
  0xe0   : >> { %v239_v33 = vld.sshfl [vmem:[#allocation1] sm:$0xff pattern:$0x75316420]  ;;  %v240_v34 = vld.sshfl [vmem:[#allocation1 + $0x8] sm:$0xff pattern:$0x75316420] }
  0xe1   : >> { %231 = vrot.lane.b32.xlu1 %v226_v32, %s447_s22  ;;  %247 = vst [vmem:[#allocation1] ss:$2 sm:$0xff] %v204_v28 }
  0xe8   : >> { %v248_v35 = vld.sshfl [vmem:[#allocation1] sm:$0xff pattern:$0x75316420]  ;;  %v249_v36 = vld.sshfl [vmem:[#allocation1 + $0x8] sm:$0xff pattern:$0x75316420] }
  0xe9   : >> { %259 = vst [vmem:[#allocation1] ss:$2 sm:$0xff] %v583_v27 }
  0xf0   : >> { %v260_v57 = vld.sshfl [vmem:[#allocation1] sm:$0xff pattern:$0x75316420]  ;;  %v261_v58 = vld.sshfl [vmem:[#allocation1 + $0x8] sm:$0xff pattern:$0x75316420] }
 0x143   : >> { %v214_v37 = vpop.permute.xlu0 %213 }
 0x14b   : >> { %v216_v38 = vpop.permute.xlu0 %215  ;;  %v230_v39 = vpop.permute.xlu1 %229 }
 0x14c   : >> { %v221_v40 = vsel %vm59_vm0, %v216_v38, %v214_v37  ;;  %v220_v41 = vsel %vm59_vm0, %v214_v37, %v216_v38 }
 0x14d   : >> { %v222_v42 = vmul.f32 %v221_v40, %v484_v2  ;;  %v223_v43 = vmul.f32 %v220_v41, %v486_v3 }
 0x14f   : >> { %v243_v45 = vsub.f32 %v222_v42, %v239_v33  ;;  %v244_v48 = vsub.f32 %v223_v43, %v240_v34 }
 0x151   : >> { %v245_v53 = vand.u32 2147483647, %v243_v45  ;;  %v246_v54 = vand.u32 2147483647, %v244_v48 }
 0x153   : >> { %v232_v44 = vpop.permute.xlu1 %231 }
 0x154   : >> { %v234_v46 = vsel %vm73_vm1, %v230_v39, %v232_v44  ;;  %v235_v47 = vsel %vm73_vm1, %v232_v44, %v230_v39 }
 0x155   : >> { %v236_v49 = vmul.f32 %v235_v47, %v488_v4  ;;  %v237_v50 = vmul.f32 %v234_v46, %v490_v5 }
 0x157   : >> { %v252_v51 = vsub.f32 %v236_v49, %v248_v35  ;;  %v253_v52 = vsub.f32 %v237_v50, %v249_v36 }
 0x159   : >> { %v254_v55 = vand.u32 2147483647, %v252_v51  ;;  %v255_v56 = vand.u32 2147483647, %v253_v52 }
 0x15b   : >> { %v256_v59 = vadd.f32 %v254_v55, %v245_v53  ;;  %v257_v60 = vadd.f32 %v255_v56, %v246_v54 }
 0x15d   : >> { %v264_v62 = vsub.f32 %v256_v59, %v260_v57  ;;  %v265_v63 = vsub.f32 %v257_v60, %v261_v58 }
 0x15f   : >> { %v267_v0 = vand.u32 2147483647, %v265_v63  ;;  %v266_v8 = vand.u32 2147483647, %v264_v62 }
 0x161   : >> { %v270_v9 = vrot.slane %v267_v0, 4 }
 0x163   : >> { %v272_v10 = vsel %vm104_vm2, %v266_v8, %v270_v9 }
 0x164   : >> { %v274_v11 = vadd.f32 %v272_v10, %v206_v1  ;;  %196 = sbr.rel (!%p194_p1) target bundleno = 195 (0xc3), region = 85 }
 0x166   : >> { %v275_v12 = vadd.f32 %v437_v14, %v274_v11  }
 0x168   : >> { %v633_v14 = vmov %v275_v12 }
 0x169   : > { %v634_v14 = vmov %v275_v12  ;;  %182 = sbr.rel (!%p180_p2) target bundleno = 191 (0xbf), region = 96  ;;  %335 = vst [vmem:[%s631_s5 + $0x8] sm:$0xff] (%p180_p2), %v275_v12 }

</bundles_post_ra>
